<compile_context>
chip_gen: v6e
topology: v6e:2x2x1
jax: 0.10.0
libtpu: 0.0.40
codegen_flags: <defaults>
</compile_context>

<pallas_src>
import jax
import jax.numpy as jnp
from jax.experimental import pallas as pl
from jax.experimental.pallas import tpu as pltpu

NUM_CLASSES = 10
BN_EPS = 1e-5
D_IN = 784              # 1 * 28 * 28 after Flatten
HIDDEN = 64
H_PAD = 128             # lane-dense padded feature width


def _round_up(x, m):
    return (x + m - 1) // m * m


def _vmem_capacity_bytes():
    """Per-core VMEM capacity; conservative fallback (v7x = 64 MiB/TC)."""
    try:
        return int(pltpu.get_tpu_info().vmem_capacity_bytes)
    except Exception:
        return 64 * 1024 * 1024


# -----------------------------------------------------------------------------
# Kernels — tiled (multi pallas_call) path
# -----------------------------------------------------------------------------
def _layer1_kernel(x_ref, w_ref, z_ref, stats_ref):
    """z = x @ W1 (bias dropped: it cancels under BatchNorm).

    Also writes this tile's per-feature (sum, sum of squares) — 2 rows only —
    so the *next* kernel can finish the full-batch BatchNorm statistics.
    """
    z = jnp.dot(x_ref[...], w_ref[...], preferred_element_type=jnp.float32)
    z_ref[...] = z.astype(z_ref.dtype)
    s = jnp.sum(z, axis=0, keepdims=True)           # (1, H_PAD)
    ss = jnp.sum(z * z, axis=0, keepdims=True)      # (1, H_PAD)
    stats_ref[...] = jnp.concatenate([s, ss], axis=0)[None]


def _bn_fold(stats_block, gamma_row, beta_row, inv_n):
    """Reduce per-tile (sum, sumsq) and fold gamma/mean into (scale, shift).

    Tiny O(num_tiles x 128) math; recomputed per grid step so it stays correct
    under megacore 'parallel' sharding (no cross-step scratch dependence).
    """
    total = jnp.sum(stats_block, axis=0)                       # (2, H_PAD)
    mean = total[0:1, :] * inv_n
    var = jnp.maximum(total[1:2, :] * inv_n - mean * mean, 0.0)
    scale = gamma_row * jax.lax.rsqrt(var + BN_EPS)            # 0 on padded features
    shift = beta_row - mean * scale
    return scale, shift


def _make_mid_kernel(block_m, n_valid, needs_mask):
    """h = relu(z_in * scale + shift) (folded BN+ReLU); z_out = h @ W.

    Emits 2-row per-tile stats of z_out for the next BatchNorm.
    """
    inv_n = 1.0 / float(n_valid)

    def kernel(stats_in_ref, gb_ref, z_in_ref, w_ref, z_out_ref, stats_out_ref):
        scale, shift = _bn_fold(stats_in_ref[...], gb_ref[0:1, :],
                                gb_ref[1:2, :], inv_n)
        # f32 elementwise path: safe on v5e (no bf16 VALU); HBM-bound anyway.
        h = jnp.maximum(z_in_ref[...].astype(jnp.float32) * scale + shift, 0.0)
        if needs_mask:
            # Zero batch-padding rows so they never pollute the next BN stats.
            row = (jax.lax.broadcasted_iota(jnp.int32, (block_m, 1), 0)
                   + pl.program_id(0) * block_m)
            h = jnp.where(row < n_valid, h, 0.0)
        z = jnp.dot(h.astype(jnp.bfloat16), w_ref[...],
                    preferred_element_type=jnp.float32)
        z_out_ref[...] = z.astype(z_out_ref.dtype)
        s = jnp.sum(z, axis=0, keepdims=True)
        ss = jnp.sum(z * z, axis=0, keepdims=True)
        stats_out_ref[...] = jnp.concatenate([s, ss], axis=0)[None]

    return kernel


def _make_final_kernel(n_valid):
    """out = relu(z_in * scale + shift) @ W4 + b4, lane-padded to 128, bf16."""
    inv_n = 1.0 / float(n_valid)

    def kernel(stats_in_ref, gbb_ref, z_in_ref, w_ref, out_ref):
        scale, shift = _bn_fold(stats_in_ref[...], gbb_ref[0:1, :],
                                gbb_ref[1:2, :], inv_n)
        h = jnp.maximum(z_in_ref[...].astype(jnp.float32) * scale + shift, 0.0)
        out = jnp.dot(h.astype(jnp.bfloat16), w_ref[...],
                      preferred_element_type=jnp.float32) + gbb_ref[2:3, :]
        out_ref[...] = out.astype(out_ref.dtype)

    return kernel


# -----------------------------------------------------------------------------
# Kernel — fused fully VMEM-resident path (small / medium batches)
# -----------------------------------------------------------------------------
def _make_fused_kernel(n_valid, n_pad):
    """Whole forward pass in one kernel: x, weights and z1..z3 stay in VMEM."""
    inv_n = 1.0 / float(n_valid)
    needs_mask = n_pad != n_valid

    def kernel(x_ref, w1_ref, w2_ref, w3_ref, w4_ref, p_ref, out_ref):
        valid = None
        if needs_mask:
            valid = jax.lax.broadcasted_iota(jnp.int32, (n_pad, 1), 0) < n_valid
        z = jnp.dot(x_ref[...], w1_ref[...], preferred_element_type=jnp.float32)
        for i, w_ref in enumerate((w2_ref, w3_ref, w4_ref)):
            mean = jnp.sum(z, axis=0, keepdims=True) * inv_n
            var = jnp.maximum(
                jnp.sum(z * z, axis=0, keepdims=True) * inv_n - mean * mean, 0.0)
            scale = p_ref[2 * i:2 * i + 1, :] * jax.lax.rsqrt(var + BN_EPS)
            shift = p_ref[2 * i + 1:2 * i + 2, :] - mean * scale
            h = jnp.maximum(z * scale + shift, 0.0)
            if needs_mask:
                h = jnp.where(valid, h, 0.0)
            z = jnp.dot(h.astype(jnp.bfloat16), w_ref[...],
                        preferred_element_type=jnp.float32)
        out_ref[...] = (z + p_ref[6:7, :]).astype(out_ref.dtype)

    return kernel


# -----------------------------------------------------------------------------
# Parameters
# -----------------------------------------------------------------------------
def init_params(key, num_classes=NUM_CLASSES):
    """Deterministic f32 params in PyTorch layout: w (out, in), b (out,)."""
    dims = [(D_IN, HIDDEN), (HIDDEN, HIDDEN), (HIDDEN, HIDDEN), (HIDDEN, num_classes)]
    params = {}
    keys = jax.random.split(key, 2 * len(dims))
    for i, (fan_in, fan_out) in enumerate(dims):
        bound = float(fan_in) ** -0.5
        params[f"w{i + 1}"] = jax.random.uniform(
            keys[2 * i], (fan_out, fan_in), jnp.float32, -bound, bound)
        params[f"b{i + 1}"] = jax.random.uniform(
            keys[2 * i + 1], (fan_out,), jnp.float32, -bound, bound)
    for i in (1, 2, 3):
        params[f"g{i}"] = jnp.ones((HIDDEN,), jnp.float32)    # BN gamma
        params[f"be{i}"] = jnp.zeros((HIDDEN,), jnp.float32)  # BN beta
    return params


def prepare_params(params, num_classes=NUM_CLASSES):
    """PyTorch-layout params -> kernel format.

    Linear weights are transposed to (in, out), zero-padded to lane-dense
    widths (64 / num_classes -> 128) and cast to bf16.  b1..b3 are dropped
    (they cancel exactly under training-mode BatchNorm mean subtraction).
    gamma/beta/b4 are packed into small f32 row blocks read by the kernels.
    """
    def pad_w(w_pt, rows, cols):
        w = jnp.asarray(w_pt, jnp.float32).T                   # (in, out)
        w = jnp.pad(w, ((0, rows - w.shape[0]), (0, cols - w.shape[1])))
        return w.astype(jnp.bfloat16)

    def pad_v(v, width=H_PAD):
        v = jnp.asarray(v, jnp.float32)
        return jnp.pad(v, (0, width - v.shape[0]))

    kp = {
        "w1": pad_w(params["w1"], D_IN, H_PAD),
        "w2": pad_w(params["w2"], H_PAD, H_PAD),
        "w3": pad_w(params["w3"], H_PAD, H_PAD),
        "w4": pad_w(params["w4"], H_PAD, H_PAD),
    }
    g = {i: pad_v(params[f"g{i}"]) for i in (1, 2, 3)}
    be = {i: pad_v(params[f"be{i}"]) for i in (1, 2, 3)}
    b4 = pad_v(params["b4"])
    kp["gb1"] = jnp.stack([g[1], be[1]])                       # (2, H_PAD)
    kp["gb2"] = jnp.stack([g[2], be[2]])                       # (2, H_PAD)
    kp["gbb3"] = jnp.stack([g[3], be[3], b4])                  # (3, H_PAD)
    kp["fused_p"] = jnp.stack(
        [g[1], be[1], g[2], be[2], g[3], be[3], b4,
         jnp.zeros((H_PAD,), jnp.float32)])                    # (8, H_PAD)
    return kp


# -----------------------------------------------------------------------------
# Forward pass
# -----------------------------------------------------------------------------
def fcn4_forward(x_nchw, params, *, num_classes=NUM_CLASSES,
                 max_block_m=None, fused_max_rows=2048):
    assert num_classes <= H_PAD
    kp = prepare_params(params, num_classes)

    n = x_nchw.shape[0]
    x = x_nchw.reshape(n, -1).astype(jnp.bfloat16)              # (n, 784) in HBM
    d_in = x.shape[1]

    vmem_cap = _vmem_capacity_bytes()
    # v7x (64 MiB/TC): ~48 MiB scoped limit; v5e/v6e (128 MiB): 64 MiB.
    vmem_budget = int(min(vmem_cap * 3 // 4, 64 * 1024 * 1024))

    # ---- Small/medium batch: single fused, fully VMEM-resident kernel ------
    n_pad16 = _round_up(n, 16)                                  # bf16 sublane quantum
    if n_pad16 <= fused_max_rows:
        if n_pad16 != n:
            x = jnp.pad(x, ((0, n_pad16 - n), (0, 0)))
        out = pl.pallas_call(
            _make_fused_kernel(n, n_pad16),
            out_shape=jax.ShapeDtypeStruct((n_pad16, H_PAD), jnp.bfloat16),
            compiler_params=pltpu.CompilerParams(vmem_limit_bytes=vmem_budget),
        )(x, kp["w1"], kp["w2"], kp["w3"], kp["w4"], kp["fused_p"])
        return out[:n, :num_classes].astype(jnp.float32)

    # ---- Large batch: tiled 4-call pipeline ---------------------------------
    # Tile cap sized from VMEM: the layer-1 x block is lane-padded to 896 in
    # VMEM (bm x 896 x 2B x 2 buffers), so 8192 rows on 128 MiB chips, 4096 on
    # 64 MiB v7x.  Also aim for >= ~4 grid steps (pipelining + v7x megacore).
    bm_cap = 8192 if vmem_cap >= 96 * 1024 * 1024 else 4096
    bm = min(bm_cap, max(16, _round_up(pl.cdiv(n, 4), 16)))
    if max_block_m is not None:
        bm = min(bm, max(16, _round_up(max_block_m, 16)))
    n_pad = _round_up(n, bm)
    if n_pad != n:
        x = jnp.pad(x, ((0, n_pad - n), (0, 0)))                # zero rows -> zero z1 rows
    num_tiles = n_pad // bm
    needs_mask = n_pad != n

    cp = pltpu.CompilerParams(
        dimension_semantics=("parallel",),                      # batch tiles across TCs
        vmem_limit_bytes=vmem_budget,
    )

    row_spec = pl.BlockSpec((bm, H_PAD), lambda i: (i, 0))
    stats_out_spec = pl.BlockSpec((1, 2, H_PAD), lambda i: (i, 0, 0))
    stats_in_spec = pl.BlockSpec((num_tiles, 2, H_PAD), lambda i: (0, 0, 0))
    gb_spec = pl.BlockSpec((2, H_PAD), lambda i: (0, 0))
    gbb_spec = pl.BlockSpec((3, H_PAD), lambda i: (0, 0))
    w_spec = pl.BlockSpec((H_PAD, H_PAD), lambda i: (0, 0))
    z_shape = jax.ShapeDtypeStruct((n_pad, H_PAD), jnp.bfloat16)
    stats_shape = jax.ShapeDtypeStruct((num_tiles, 2, H_PAD), jnp.float32)

    # ---- Layer 1: z1 = x @ W1  (+ 2-row partial BN stats) -------------------
    z1, st1 = pl.pallas_call(
        _layer1_kernel,
        grid=(num_tiles,),
        in_specs=[pl.BlockSpec((bm, d_in), lambda i: (i, 0)),   # 784-wide in HBM
                  pl.BlockSpec((d_in, H_PAD), lambda i: (0, 0))],
        out_specs=(row_spec, stats_out_spec),
        out_shape=(z_shape, stats_shape),
        compiler_params=cp,
    )(x, kp["w1"])

    # ---- Layers 2 & 3: in-kernel BN stats reduce + BN+ReLU fused matmul -----
    mid_kernel = _make_mid_kernel(bm, n, needs_mask)

    def mid_call(stats, gb, z_in, w):
        return pl.pallas_call(
            mid_kernel,
            grid=(num_tiles,),
            in_specs=[stats_in_spec, gb_spec, row_spec, w_spec],
            out_specs=(row_spec, stats_out_spec),
            out_shape=(z_shape, stats_shape),
            compiler_params=cp,
        )(stats, gb, z_in, w)

    z2, st2 = mid_call(st1, kp["gb1"], z1, kp["w2"])
    z3, st3 = mid_call(st2, kp["gb2"], z2, kp["w3"])

    # ---- Layer 4: BN+ReLU + matmul + bias, lane-dense bf16 (n_pad, 128) -----
    out = pl.pallas_call(
        _make_final_kernel(n),
        grid=(num_tiles,),
        in_specs=[stats_in_spec, gbb_spec, row_spec, w_spec],
        out_specs=pl.BlockSpec((bm, H_PAD), lambda i: (i, 0)),
        out_shape=jax.ShapeDtypeStruct((n_pad, H_PAD), jnp.bfloat16),
        compiler_params=cp,
    )(st3, kp["gbb3"], z3, kp["w4"])

    return out[:n, :num_classes].astype(jnp.float32)


# -----------------------------------------------------------------------------
# Pure-JAX reference (f32, faithful to the PyTorch module in training mode)
# -----------------------------------------------------------------------------
def fcn4_reference(x_nchw, params):
    h = x_nchw.reshape(x_nchw.shape[0], -1).astype(jnp.float32)
    for i in (1, 2, 3):
        h = h @ params[f"w{i}"].T + params[f"b{i}"]
        mu = jnp.mean(h, axis=0, keepdims=True)
        var = jnp.mean((h - mu) ** 2, axis=0, keepdims=True)
        h = (h - mu) / jnp.sqrt(var + BN_EPS)
        h = jnp.maximum(h * params[f"g{i}"] + params[f"be{i}"], 0.0)
    return h @ params["w4"].T + params["b4"]


if __name__ == "__main__":
    key = jax.random.PRNGKey(0)
    k_param, k_x = jax.random.split(key)
    params = init_params(k_param, NUM_CLASSES)

    # Small batch, deliberately not a multiple of 16 so the batch-padding /
    # row-masking path is exercised.
    n = 30
    x = jax.random.normal(k_x, (n, 1, 28, 28), jnp.float32)
    ref = fcn4_reference(x, params)

    # 1) Fused, fully VMEM-resident path (default for small batches).
    out_fused = jax.block_until_ready(fcn4_forward(x, params))
    assert out_fused.shape == (n, NUM_CLASSES)
    err_f = float(jnp.max(jnp.abs(out_fused - ref)))
    assert jnp.allclose(out_fused, ref, atol=7e-2, rtol=7e-2), \
        f"fused path mismatch vs JAX reference (max abs err {err_f})"

    # 2) Tiled multi-call path (2 batch tiles, row masking, in-kernel BN stats).
    out_tiled = jax.block_until_ready(
        fcn4_forward(x, params, fused_max_rows=0, max_block_m=16))
    err_t = float(jnp.max(jnp.abs(out_tiled - ref)))
    assert jnp.allclose(out_tiled, ref, atol=7e-2, rtol=7e-2), \
        f"tiled path mismatch vs JAX reference (max abs err {err_t})"

    print("KERNEL_OK")
</pallas_src>

<mosaic_0001>
module attributes {stable_mosaic.version = 11 : i64} {
  func.func @kernel(%arg0: memref<32x784xbf16, #tpu.memory_space<vmem>>, %arg1: memref<784x128xbf16, #tpu.memory_space<vmem>>, %arg2: memref<128x128xbf16, #tpu.memory_space<vmem>>, %arg3: memref<128x128xbf16, #tpu.memory_space<vmem>>, %arg4: memref<128x128xbf16, #tpu.memory_space<vmem>>, %arg5: memref<8x128xf32, #tpu.memory_space<vmem>>, %arg6: memref<32x128xbf16, #tpu.memory_space<vmem>>) attributes {dimension_semantics = [], scalar_prefetch = 0 : i64, scratch_operands = 0 : i64, tpu.core_type = #tpu.core_type<tc>} {
    %0 = tpu.iota {dimensions = array<i32: 0>} : vector<32x1xi32>
    %c30_i32 = arith.constant 30 : i32
    %1 = vector.broadcast %c30_i32 : i32 to vector<32x1xi32>
    %2 = arith.cmpi slt, %0, %1 : vector<32x1xi32>
    %c0 = arith.constant 0 : index
    %c0_0 = arith.constant 0 : index
    %3 = vector.load %arg0[%c0, %c0_0] : memref<32x784xbf16, #tpu.memory_space<vmem>>, vector<32x784xbf16>
    %c0_1 = arith.constant 0 : index
    %c0_2 = arith.constant 0 : index
    %4 = vector.load %arg1[%c0_1, %c0_2] : memref<784x128xbf16, #tpu.memory_space<vmem>>, vector<784x128xbf16>
    %cst = arith.constant dense<0.000000e+00> : vector<32x128xf32>
    %5 = tpu.matmul %3, %4, %cst {dimension_numbers = #tpu.dot_dimension_numbers<[1], [0], [0], [1], [0, 0, 1, 1], [], []>} : vector<32x784xbf16>, vector<784x128xbf16>, vector<32x128xf32> -> vector<32x128xf32>
    %cst_3 = arith.constant dense<0.000000e+00> : vector<128xf32>
    %6 = vector.multi_reduction <add>, %5, %cst_3 [0] : vector<32x128xf32> to vector<128xf32>
    %7 = vector.shape_cast %6 : vector<128xf32> to vector<1x128xf32>
    %cst_4 = arith.constant 0.0333333351 : f32
    %8 = vector.broadcast %cst_4 : f32 to vector<1x128xf32>
    %9 = arith.mulf %7, %8 : vector<1x128xf32>
    %10 = arith.mulf %5, %5 : vector<32x128xf32>
    %cst_5 = arith.constant dense<0.000000e+00> : vector<128xf32>
    %11 = vector.multi_reduction <add>, %10, %cst_5 [0] : vector<32x128xf32> to vector<128xf32>
    %12 = vector.shape_cast %11 : vector<128xf32> to vector<1x128xf32>
    %cst_6 = arith.constant 0.0333333351 : f32
    %13 = vector.broadcast %cst_6 : f32 to vector<1x128xf32>
    %14 = arith.mulf %12, %13 : vector<1x128xf32>
    %15 = arith.mulf %9, %9 : vector<1x128xf32>
    %16 = arith.subf %14, %15 : vector<1x128xf32>
    %cst_7 = arith.constant 0.000000e+00 : f32
    %17 = vector.broadcast %cst_7 : f32 to vector<1x128xf32>
    %18 = arith.maximumf %16, %17 : vector<1x128xf32>
    %c0_8 = arith.constant 0 : index
    %c0_9 = arith.constant 0 : index
    %19 = vector.load %arg5[%c0_8, %c0_9] : memref<8x128xf32, #tpu.memory_space<vmem>>, vector<1x128xf32>
    %cst_10 = arith.constant 9.99999974E-6 : f32
    %20 = vector.broadcast %cst_10 : f32 to vector<1x128xf32>
    %21 = arith.addf %18, %20 : vector<1x128xf32>
    %22 = math.rsqrt %21 : vector<1x128xf32>
    %23 = arith.mulf %19, %22 : vector<1x128xf32>
    %c1 = arith.constant 1 : index
    %c0_11 = arith.constant 0 : index
    %24 = vector.load %arg5[%c1, %c0_11] : memref<8x128xf32, #tpu.memory_space<vmem>>, vector<1x128xf32>
    %25 = arith.mulf %9, %23 : vector<1x128xf32>
    %26 = arith.subf %24, %25 : vector<1x128xf32>
    %27 = vector.broadcast %23 : vector<1x128xf32> to vector<32x128xf32>
    %28 = arith.mulf %5, %27 : vector<32x128xf32>
    %29 = vector.broadcast %26 : vector<1x128xf32> to vector<32x128xf32>
    %30 = arith.addf %28, %29 : vector<32x128xf32>
    %cst_12 = arith.constant 0.000000e+00 : f32
    %31 = vector.broadcast %cst_12 : f32 to vector<32x128xf32>
    %32 = arith.maximumf %30, %31 : vector<32x128xf32>
    %cst_13 = arith.constant 0.000000e+00 : f32
    %33 = vector.shape_cast %2 : vector<32x1xi1> to vector<32x1xi1>
    %34 = vector.broadcast %33 : vector<32x1xi1> to vector<32x128xi1>
    %35 = vector.broadcast %cst_13 : f32 to vector<32x128xf32>
    %36 = arith.select %34, %32, %35 : vector<32x128xi1>, vector<32x128xf32>
    %37 = arith.truncf %36 : vector<32x128xf32> to vector<32x128xbf16>
    %c0_14 = arith.constant 0 : index
    %c0_15 = arith.constant 0 : index
    %38 = vector.load %arg2[%c0_14, %c0_15] : memref<128x128xbf16, #tpu.memory_space<vmem>>, vector<128x128xbf16>
    %cst_16 = arith.constant dense<0.000000e+00> : vector<32x128xf32>
    %39 = tpu.matmul %37, %38, %cst_16 {dimension_numbers = #tpu.dot_dimension_numbers<[1], [0], [0], [1], [0, 0, 1, 1], [], []>} : vector<32x128xbf16>, vector<128x128xbf16>, vector<32x128xf32> -> vector<32x128xf32>
    %cst_17 = arith.constant dense<0.000000e+00> : vector<128xf32>
    %40 = vector.multi_reduction <add>, %39, %cst_17 [0] : vector<32x128xf32> to vector<128xf32>
    %41 = vector.shape_cast %40 : vector<128xf32> to vector<1x128xf32>
    %cst_18 = arith.constant 0.0333333351 : f32
    %42 = vector.broadcast %cst_18 : f32 to vector<1x128xf32>
    %43 = arith.mulf %41, %42 : vector<1x128xf32>
    %44 = arith.mulf %39, %39 : vector<32x128xf32>
    %cst_19 = arith.constant dense<0.000000e+00> : vector<128xf32>
    %45 = vector.multi_reduction <add>, %44, %cst_19 [0] : vector<32x128xf32> to vector<128xf32>
    %46 = vector.shape_cast %45 : vector<128xf32> to vector<1x128xf32>
    %cst_20 = arith.constant 0.0333333351 : f32
    %47 = vector.broadcast %cst_20 : f32 to vector<1x128xf32>
    %48 = arith.mulf %46, %47 : vector<1x128xf32>
    %49 = arith.mulf %43, %43 : vector<1x128xf32>
    %50 = arith.subf %48, %49 : vector<1x128xf32>
    %cst_21 = arith.constant 0.000000e+00 : f32
    %51 = vector.broadcast %cst_21 : f32 to vector<1x128xf32>
    %52 = arith.maximumf %50, %51 : vector<1x128xf32>
    %c2 = arith.constant 2 : index
    %c0_22 = arith.constant 0 : index
    %53 = vector.load %arg5[%c2, %c0_22] : memref<8x128xf32, #tpu.memory_space<vmem>>, vector<1x128xf32>
    %cst_23 = arith.constant 9.99999974E-6 : f32
    %54 = vector.broadcast %cst_23 : f32 to vector<1x128xf32>
    %55 = arith.addf %52, %54 : vector<1x128xf32>
    %56 = math.rsqrt %55 : vector<1x128xf32>
    %57 = arith.mulf %53, %56 : vector<1x128xf32>
    %c3 = arith.constant 3 : index
    %c0_24 = arith.constant 0 : index
    %58 = vector.load %arg5[%c3, %c0_24] : memref<8x128xf32, #tpu.memory_space<vmem>>, vector<1x128xf32>
    %59 = arith.mulf %43, %57 : vector<1x128xf32>
    %60 = arith.subf %58, %59 : vector<1x128xf32>
    %61 = vector.broadcast %57 : vector<1x128xf32> to vector<32x128xf32>
    %62 = arith.mulf %39, %61 : vector<32x128xf32>
    %63 = vector.broadcast %60 : vector<1x128xf32> to vector<32x128xf32>
    %64 = arith.addf %62, %63 : vector<32x128xf32>
    %cst_25 = arith.constant 0.000000e+00 : f32
    %65 = vector.broadcast %cst_25 : f32 to vector<32x128xf32>
    %66 = arith.maximumf %64, %65 : vector<32x128xf32>
    %cst_26 = arith.constant 0.000000e+00 : f32
    %67 = vector.shape_cast %2 : vector<32x1xi1> to vector<32x1xi1>
    %68 = vector.broadcast %67 : vector<32x1xi1> to vector<32x128xi1>
    %69 = vector.broadcast %cst_26 : f32 to vector<32x128xf32>
    %70 = arith.select %68, %66, %69 : vector<32x128xi1>, vector<32x128xf32>
    %71 = arith.truncf %70 : vector<32x128xf32> to vector<32x128xbf16>
    %c0_27 = arith.constant 0 : index
    %c0_28 = arith.constant 0 : index
    %72 = vector.load %arg3[%c0_27, %c0_28] : memref<128x128xbf16, #tpu.memory_space<vmem>>, vector<128x128xbf16>
    %cst_29 = arith.constant dense<0.000000e+00> : vector<32x128xf32>
    %73 = tpu.matmul %71, %72, %cst_29 {dimension_numbers = #tpu.dot_dimension_numbers<[1], [0], [0], [1], [0, 0, 1, 1], [], []>} : vector<32x128xbf16>, vector<128x128xbf16>, vector<32x128xf32> -> vector<32x128xf32>
    %cst_30 = arith.constant dense<0.000000e+00> : vector<128xf32>
    %74 = vector.multi_reduction <add>, %73, %cst_30 [0] : vector<32x128xf32> to vector<128xf32>
    %75 = vector.shape_cast %74 : vector<128xf32> to vector<1x128xf32>
    %cst_31 = arith.constant 0.0333333351 : f32
    %76 = vector.broadcast %cst_31 : f32 to vector<1x128xf32>
    %77 = arith.mulf %75, %76 : vector<1x128xf32>
    %78 = arith.mulf %73, %73 : vector<32x128xf32>
    %cst_32 = arith.constant dense<0.000000e+00> : vector<128xf32>
    %79 = vector.multi_reduction <add>, %78, %cst_32 [0] : vector<32x128xf32> to vector<128xf32>
    %80 = vector.shape_cast %79 : vector<128xf32> to vector<1x128xf32>
    %cst_33 = arith.constant 0.0333333351 : f32
    %81 = vector.broadcast %cst_33 : f32 to vector<1x128xf32>
    %82 = arith.mulf %80, %81 : vector<1x128xf32>
    %83 = arith.mulf %77, %77 : vector<1x128xf32>
    %84 = arith.subf %82, %83 : vector<1x128xf32>
    %cst_34 = arith.constant 0.000000e+00 : f32
    %85 = vector.broadcast %cst_34 : f32 to vector<1x128xf32>
    %86 = arith.maximumf %84, %85 : vector<1x128xf32>
    %c4 = arith.constant 4 : index
    %c0_35 = arith.constant 0 : index
    %87 = vector.load %arg5[%c4, %c0_35] : memref<8x128xf32, #tpu.memory_space<vmem>>, vector<1x128xf32>
    %cst_36 = arith.constant 9.99999974E-6 : f32
    %88 = vector.broadcast %cst_36 : f32 to vector<1x128xf32>
    %89 = arith.addf %86, %88 : vector<1x128xf32>
    %90 = math.rsqrt %89 : vector<1x128xf32>
    %91 = arith.mulf %87, %90 : vector<1x128xf32>
    %c5 = arith.constant 5 : index
    %c0_37 = arith.constant 0 : index
    %92 = vector.load %arg5[%c5, %c0_37] : memref<8x128xf32, #tpu.memory_space<vmem>>, vector<1x128xf32>
    %93 = arith.mulf %77, %91 : vector<1x128xf32>
    %94 = arith.subf %92, %93 : vector<1x128xf32>
    %95 = vector.broadcast %91 : vector<1x128xf32> to vector<32x128xf32>
    %96 = arith.mulf %73, %95 : vector<32x128xf32>
    %97 = vector.broadcast %94 : vector<1x128xf32> to vector<32x128xf32>
    %98 = arith.addf %96, %97 : vector<32x128xf32>
    %cst_38 = arith.constant 0.000000e+00 : f32
    %99 = vector.broadcast %cst_38 : f32 to vector<32x128xf32>
    %100 = arith.maximumf %98, %99 : vector<32x128xf32>
    %cst_39 = arith.constant 0.000000e+00 : f32
    %101 = vector.shape_cast %2 : vector<32x1xi1> to vector<32x1xi1>
    %102 = vector.broadcast %101 : vector<32x1xi1> to vector<32x128xi1>
    %103 = vector.broadcast %cst_39 : f32 to vector<32x128xf32>
    %104 = arith.select %102, %100, %103 : vector<32x128xi1>, vector<32x128xf32>
    %105 = arith.truncf %104 : vector<32x128xf32> to vector<32x128xbf16>
    %c0_40 = arith.constant 0 : index
    %c0_41 = arith.constant 0 : index
    %106 = vector.load %arg4[%c0_40, %c0_41] : memref<128x128xbf16, #tpu.memory_space<vmem>>, vector<128x128xbf16>
    %cst_42 = arith.constant dense<0.000000e+00> : vector<32x128xf32>
    %107 = tpu.matmul %105, %106, %cst_42 {dimension_numbers = #tpu.dot_dimension_numbers<[1], [0], [0], [1], [0, 0, 1, 1], [], []>} : vector<32x128xbf16>, vector<128x128xbf16>, vector<32x128xf32> -> vector<32x128xf32>
    %c6 = arith.constant 6 : index
    %c0_43 = arith.constant 0 : index
    %108 = vector.load %arg5[%c6, %c0_43] : memref<8x128xf32, #tpu.memory_space<vmem>>, vector<1x128xf32>
    %109 = vector.broadcast %108 : vector<1x128xf32> to vector<32x128xf32>
    %110 = arith.addf %107, %109 : vector<32x128xf32>
    %111 = arith.truncf %110 : vector<32x128xf32> to vector<32x128xbf16>
    %c0_44 = arith.constant 0 : index
    %c0_45 = arith.constant 0 : index
    %112 = vector.load %arg6[%c0_44, %c0_45] : memref<32x128xbf16, #tpu.memory_space<vmem>>, vector<32x128xbf16>
    tpu.vector_store %arg6[%c0_44, %c0_45], %111 {strides = array<i32>} : memref<32x128xbf16, #tpu.memory_space<vmem>>, vector<32x128xbf16>,
    return
  }
}

</mosaic_0001>

<bundles_post_ra>
// kernel: tpu_custom_call.1
= control target key start
LH: loop header
LB: loop body
LE: loop exit
PB: predicated region body
PF: predicated region fallthrough
CT: control target
= control target key end

     0   :  { %11 = vsyncpa [#allocation3], 0  ;;  %s2011_s0 = inlined_call_operand.hbm [shape: bf16[32,784], index: 0, kind: input, shape index: {}]   ;;  %s2012_s1 = inlined_call_operand.hbm [shape: bf16[784,128], index: 1, kind: input, shape index: {}]   ;;  %s2013_s2 = inlined_call_operand.hbm [shape: bf16[128,128], index: 2, kind: input, shape index: {}]   ;;  %s2014_s3 = inlined_call_operand.hbm [shape: bf16[128,128], index: 3, kind: input, shape index: {}]   ;;  %s2015_s4 = inlined_call_operand.hbm [shape: bf16[128,128], index: 4, kind: input, shape index: {}]   ;;  %s2016_s5 = inlined_call_operand.vmem [shape: f32[8,128], index: 5, kind: input, shape index: {}]   ;;  %s2017_s6 = inlined_call_operand.hbm [shape: bf16[32,128], index: 6, kind: output, shape index: {}]  }
   0x1   :  { %12 = vsyncpa [#allocation6], 0 }
   0x2   :  { %13 = vsyncpa [#allocation9], 0 }
   0x3   :  { %14 = vsyncpa [#allocation4], 0  ;;  %s1893_s21 = smov [#allocation5]  }
   0x4   :  { %s32_s22 = sshll.u32 %s1893_s21, 4  ;;  %s33_s22 = int_to_ptr.vmem [resolvable:$true] %s32_s22 }
   0x5   :  { %s1773_s23 = scalar_lea.vmem %s33_s22, 6272  ;;  %p1778_p1 = scmp.lt.s32.totalorder %s33_s22, %s33_s22 }
   0x6   :  { %p1774_p0 = scmp.ne.s32.totalorder %s33_s22, %s1773_s23  ;;  %p1779_p2 = scmp.lt.s32.totalorder %s1773_s23, %s1773_s23 }
   0x8   :  { %p1780_p3 = por %p1779_p2, %p1778_p1 }
   0xa   :  { %p1781_p4 = pnand %p1780_p3, %p1774_p0 }
   0xc   :  { %1784 = shalt.err (!%p1781_p4)
}
   0xd   :  { %s1894_s24 = smov 64   ;;  %s1895_s25 = smov 4  }
   0xe   :  { %38 = dma.hbm_to_vmem [thread:$0]  %s2012_s1, 6272, %s33_s22, [#allocation6], %s1894_s24, %s1894_s24, %s1895_s25  }
   0xf   :  { %s1896_s28 = smov [#allocation8]   ;;  %s1897_s30 = smov [#allocation2]  }
  0x10   :  { %s56_s29 = sshll.u32 %s1896_s28, 4  ;;  %s20_s7 = sshll.u32 %s1897_s30, 4  ;;  %s57_s29 = int_to_ptr.vmem [resolvable:$true] %s56_s29  ;;  %s21_s7 = int_to_ptr.vmem [resolvable:$true] %s20_s7 }
  0x11   :  { %s1793_s8 = scalar_lea.vmem %s57_s29, 1024  ;;  %p1798_p6 = scmp.lt.s32.totalorder %s57_s29, %s57_s29 }
  0x12   :  { %p1794_p5 = scmp.ne.s32.totalorder %s57_s29, %s1793_s8  ;;  %p1799_p7 = scmp.lt.s32.totalorder %s1793_s8, %s1793_s8 }
  0x14   :  { %p1800_p8 = por %p1799_p7, %p1798_p6 }
  0x16   :  { %p1801_p9 = pnand %p1800_p8, %p1794_p5 }
  0x18   :  { %1804 = shalt.err (!%p1801_p9)
}
  0x19   :  { %62 = dma.hbm_to_vmem [thread:$0]  %s2014_s3, 1024, %s57_s29, [#allocation9], %s1894_s24, %s1894_s24, %s1895_s25  }
  0x1a   :  { %s1813_s1 = scalar_lea.vmem %s21_s7, 1792  ;;  %p1818_p11 = scmp.lt.s32.totalorder %s21_s7, %s21_s7 }
  0x1b   :  { %p1814_p10 = scmp.ne.s32.totalorder %s21_s7, %s1813_s1  ;;  %p1819_p12 = scmp.lt.s32.totalorder %s1813_s1, %s1813_s1 }
  0x1d   :  { %p1820_p13 = por %p1819_p12, %p1818_p11 }
  0x1f   :  { %p1821_p0 = pnand %p1820_p13, %p1814_p10 }
  0x21   :  { %1824 = shalt.err (!%p1821_p0)
}
  0x22   :  { %s1898_s11 = smov 448   ;;  %s1899_s12 = smov 28  }
  0x23   :  { %26 = dma.hbm_to_vmem [thread:$0]  %s2011_s0, 1792, %s21_s7, [#allocation3], %s1898_s11, %s1898_s11, %s1899_s12  }
  0x24   :  { %s1900_s15 = smov [#allocation7]   ;;  %s1901_s17 = smov [#allocation10]  }
  0x25   :  { %s44_s16 = sshll.u32 %s1900_s15, 4  ;;  %s68_s18 = sshll.u32 %s1901_s17, 4  ;;  %s45_s16 = int_to_ptr.vmem [resolvable:$true] %s44_s16  ;;  %s69_s18 = int_to_ptr.vmem [resolvable:$true] %s68_s18 }
  0x26   :  { %s1833_s3 = scalar_lea.vmem %s45_s16, 1024  ;;  %p1838_p2 = scmp.lt.s32.totalorder %s45_s16, %s45_s16 }
  0x27   :  { %p1834_p1 = scmp.ne.s32.totalorder %s45_s16, %s1833_s3  ;;  %p1839_p3 = scmp.lt.s32.totalorder %s1833_s3, %s1833_s3 }
  0x29   :  { %p1840_p4 = por %p1839_p3, %p1838_p2 }
  0x2b   :  { %p1841_p5 = pnand %p1840_p4, %p1834_p1 }
  0x2d   :  { %1844 = shalt.err (!%p1841_p5)
}
  0x2e   :  { %50 = dma.hbm_to_vmem [thread:$0]  %s2013_s2, 1024, %s45_s16, [#allocation6], %s1894_s24, %s1894_s24, %s1895_s25  }
  0x2f   :  { %s1853_s0 = scalar_lea.vmem %s69_s18, 1024  ;;  %p1858_p7 = scmp.lt.s32.totalorder %s69_s18, %s69_s18 }
  0x30   :  { %p1854_p6 = scmp.ne.s32.totalorder %s69_s18, %s1853_s0  ;;  %p1859_p8 = scmp.lt.s32.totalorder %s1853_s0, %s1853_s0 }
  0x32   :  { %p1860_p9 = por %p1859_p8, %p1858_p7 }
  0x34   :  { %p1861_p10 = pnand %p1860_p9, %p1854_p6 }
  0x36   :  { %1864 = shalt.err (!%p1861_p10)
}
  0x37   :  { %74 = dma.hbm_to_vmem [thread:$0]  %s2015_s4, 1024, %s69_s18, [#allocation9], %s1894_s24, %s1894_s24, %s1895_s25  }
  0x38   :  { %1885 = dma.done.wait [#allocation3], 1792  }
  0x39   :  { %1886 = vsyncadd [#allocation3], 4294965504 }
  0x3a   :  { %1887 = dma.done.wait [#allocation6], 7296  }
  0x3b   :  { %1888 = vsyncadd [#allocation6], 4294960000 }
  0x3c   :  { %1889 = dma.done.wait [#allocation9], 2048  }
  0x3d   :  { %1890 = vsyncadd [#allocation9], 4294965248  ;;  %v1666_v0 = vld [vmem:[#allocation5 + $0x78] sm:$0xff]   ;;  %v1670_v4 = vld [vmem:[#allocation5 + $0x70] sm:$0xff]   ;;  %vm580_vm0 = vcmask 130048   ;;  %vm1902_vm2 = vmmov 1  }
  0x3e   :  { %v1667_v1 = vld [vmem:[#allocation5 + $0xf8] sm:$0xff]   ;;  %1472 = vmatprep.subr.bf16.mxu0 %v1666_v0  ;;  %v1671_v5 = vld [vmem:[#allocation5 + $0xf0] sm:$0xff]   ;;  %v1674_v8 = vld [vmem:[#allocation5 + $0x68] sm:$0xff]   ;;  %s1903_s12 = smov [#allocation11]  }
  0x3f   :  { %v1668_v2 = vld [vmem:[#allocation5 + $0x38] sm:$0xff]   ;;  %1500 = vmatprep.subr.bf16.mxu1 %v1667_v1  ;;  %v1672_v6 = vld [vmem:[#allocation5 + $0x30] sm:$0xff]   ;;  %v1675_v9 = vld [vmem:[#allocation5 + $0xe8] sm:$0xff]   ;;  %s1340_s13 = sshll.u32 %s1903_s12, 4  ;;  %s1341_s13 = int_to_ptr.vmem [resolvable:$true] %s1340_s13 }
  0x40   :  { %v1669_v3 = vld [vmem:[#allocation5 + $0xb8] sm:$0xff]   ;;  %1473 = vmatpush3.bf16.msra.mxu0 %v1668_v2  ;;  %v1673_v7 = vld [vmem:[#allocation5 + $0xb0] sm:$0xff]   ;;  %v1676_v10 = vld [vmem:[#allocation5 + $0x28] sm:$0xff]   ;;  %s1865_s14 = scalar_lea.vmem %s1341_s13, 256  ;;  %p1870_p12 = scmp.lt.s32.totalorder %s1341_s13, %s1341_s13 }
  0x41   :  { %1501 = vmatpush3.bf16.msra.mxu1 %v1669_v3  ;;  %1474 = vmatprep.subr.bf16.mxu0 %v1670_v4  ;;  %v1677_v11 = vld [vmem:[#allocation5 + $0xa8] sm:$0xff]   ;;  %v1678_v12 = vld [vmem:[#allocation5 + $0x60] sm:$0xff]   ;;  %v1682_v16 = vld [vmem:[#allocation5 + $0x58] sm:$0xff]   ;;  %p1866_p11 = scmp.ne.s32.totalorder %s1341_s13, %s1865_s14  ;;  %p1871_p13 = scmp.lt.s32.totalorder %s1865_s14, %s1865_s14 }
  0x42   :  { %1502 = vmatprep.subr.bf16.mxu1 %v1671_v5  ;;  %v1679_v13 = vld [vmem:[#allocation5 + $0xe0] sm:$0xff]   ;;  %v1683_v17 = vld [vmem:[#allocation5 + $0xd8] sm:$0xff]   ;;  %v1686_v20 = vld [vmem:[#allocation5 + $0x50] sm:$0xff]  }
  0x43   :  { %v1680_v14 = vld [vmem:[#allocation5 + $0x20] sm:$0xff]   ;;  %v1684_v18 = vld [vmem:[#allocation5 + $0x18] sm:$0xff]   ;;  %v1687_v21 = vld [vmem:[#allocation5 + $0xd0] sm:$0xff]   ;;  %p1872_p0 = por %p1871_p13, %p1870_p12 }
  0x44   :  { %1475 = vmatpush3.bf16.msra.mxu0 %v1672_v6  ;;  %v1681_v15 = vld [vmem:[#allocation5 + $0xa0] sm:$0xff]   ;;  %v1685_v19 = vld [vmem:[#allocation5 + $0x98] sm:$0xff]   ;;  %v1688_v22 = vld [vmem:[#allocation5 + $0x10] sm:$0xff]  }
  0x45   :  { %1503 = vmatpush3.bf16.msra.mxu1 %v1673_v7  ;;  %1476 = vmatprep.subr.bf16.mxu0 %v1674_v8  ;;  %v1689_v23 = vld [vmem:[#allocation5 + $0x90] sm:$0xff]   ;;  %v1690_v24 = vld [vmem:[#allocation5 + $0x48] sm:$0xff]   ;;  %v1694_v28 = vld [vmem:[#allocation5 + $0x40] sm:$0xff]   ;;  %p1873_p1 = pnand %p1872_p0, %p1866_p11 }
  0x46   :  { %1504 = vmatprep.subr.bf16.mxu1 %v1675_v9  ;;  %v1691_v25 = vld [vmem:[#allocation5 + $0xc8] sm:$0xff]   ;;  %v1695_v29 = vld [vmem:[#allocation5 + $0xc0] sm:$0xff]   ;;  %v1700_v33 = vld [vmem:[#allocation2 + $0x4] ss:$28 sps:$4 sm:$0xff]  }
  0x47   :  { %v1692_v26 = vld [vmem:[#allocation5 + $0x8] sm:$0xff]   ;;  %v1696_v30 = vld [vmem:[#allocation5] sm:$0xff]   ;;  %v1701_v34 = vld [vmem:[#allocation2 + $0x8] ss:$28 sps:$4 sm:$0xff]   ;;  %619 = vmatprep.mubr.bf16.mxu0 %v1700_v33 }
  0x48   :  { %1477 = vmatpush3.bf16.msra.mxu0 %v1676_v10  ;;  %v1693_v27 = vld [vmem:[#allocation5 + $0x88] sm:$0xff]   ;;  %v1697_v31 = vld [vmem:[#allocation5 + $0x80] sm:$0xff]   ;;  %v1703_v35 = vld [vmem:[#allocation2 + $0xc] ss:$28 sps:$4 sm:$0xff]  }
  0x49   :  { %1505 = vmatpush3.bf16.msra.mxu1 %v1677_v11  ;;  %1478 = vmatprep.subr.bf16.mxu0 %v1678_v12  ;;  %v1698_v32 = vld [vmem:[#allocation2] ss:$28 sps:$4 sm:$0xff]   ;;  %v1704_v36 = vld [vmem:[#allocation5 + $0x178] sm:$0xff]   ;;  %v1710_v42 = vld [vmem:[#allocation5 + $0x160] sm:$0xff]  }
  0x4a   :  { %1506 = vmatprep.subr.bf16.mxu1 %v1679_v13  ;;  %668 = vmatprep.mubr.bf16.mxu1 %v1703_v35  ;;  %v1705_v37 = vld [vmem:[#allocation5 + $0x138] sm:$0xff]   ;;  %v1706_v38 = vld [vmem:[#allocation5 + $0x170] sm:$0xff]   ;;  %v1708_v40 = vld [vmem:[#allocation5 + $0x168] sm:$0xff]  }
  0x4b   :  { %v1707_v39 = vld [vmem:[#allocation5 + $0x130] sm:$0xff]   ;;  %v1709_v41 = vld [vmem:[#allocation5 + $0x128] sm:$0xff]   ;;  %v1711_v43 = vld [vmem:[#allocation5 + $0x120] sm:$0xff]  }
  0x4c   :  { %1479 = vmatpush3.bf16.msra.mxu0 %v1680_v14  ;;  %v1713_v44 = vld [vmem:[#allocation2 + $0x3c] ss:$28 sps:$4 sm:$0xff]   ;;  %v1715_v45 = vld [vmem:[#allocation2 + $0x44] ss:$28 sps:$4 sm:$0xff]   ;;  %v1712_v46 = vld [vmem:[#allocation5 + $0x158] sm:$0xff]  }
  0x4d   :  { %1507 = vmatpush3.bf16.msra.mxu1 %v1681_v15  ;;  %1480 = vmatprep.subr.bf16.mxu0 %v1682_v16  ;;  %v1718_v47 = vld [vmem:[#allocation2 + $0x38] ss:$28 sps:$4 sm:$0xff]   ;;  %v1719_v48 = vld [vmem:[#allocation2 + $0x40] ss:$28 sps:$4 sm:$0xff]   ;;  %v1717_v49 = vld [vmem:[#allocation5 + $0x118] sm:$0xff]  }
  0x4e   :  { %1508 = vmatprep.subr.bf16.mxu1 %v1683_v17  ;;  %v1722_v50 = vld [vmem:[#allocation5 + $0x180] sm:$0xff]   ;;  %v1720_v51 = vld [vmem:[#allocation5 + $0x150] sm:$0xff]   ;;  %v1723_v53 = vld [vmem:[#allocation5 + $0x148] sm:$0xff]  }
  0x4f   :  { %v1721_v52 = vld [vmem:[#allocation5 + $0x110] sm:$0xff]   ;;  %v1729_v54 = vld [vmem:[#allocation2 + $0x14] ss:$28 sps:$4 sm:$0xff]   ;;  %v1724_v57 = vld [vmem:[#allocation5 + $0x108] sm:$0xff]  }
  0x50   :  { %1481 = vmatpush3.bf16.msra.mxu0 %v1684_v18  ;;  %v1730_v55 = vld [vmem:[#allocation2 + $0x18] ss:$28 sps:$4 sm:$0xff]   ;;  %v1731_v56 = vld [vmem:[#allocation2 + $0x50] ss:$28 sps:$4 sm:$0xff]   ;;  %v1734_v62 = vld [vmem:[#allocation2 + $0x48] ss:$28 sps:$4 sm:$0xff]  }
  0x51   :  { %1509 = vmatpush3.bf16.msra.mxu1 %v1685_v19  ;;  %1482 = vmatprep.subr.bf16.mxu0 %v1686_v20  ;;  %v1725_v58 = vld [vmem:[#allocation5 + $0x140] sm:$0xff]   ;;  %v1732_v61 = vld [vmem:[#allocation2 + $0x4c] ss:$28 sps:$4 sm:$0xff]   ;;  %v1737_v1 = vld [vmem:[#allocation7 + $0x28] sm:$0xff]  }
  0x52   :  { %1510 = vmatprep.subr.bf16.mxu1 %v1687_v21  ;;  %v1726_v59 = vld [vmem:[#allocation5 + $0x100] sm:$0xff]   ;;  %v1736_v0 = vld [vmem:[#allocation7 + $0x30] sm:$0xff]   ;;  %v1738_v2 = vld [vmem:[#allocation7 + $0x20] sm:$0xff]  }
  0x53   :  { %v1727_v60 = vld [vmem:[#allocation2 + $0x10] ss:$28 sps:$4 sm:$0xff]   ;;  %v1741_v5 = vld [vmem:[#allocation7 + $0x8] sm:$0xff]   ;;  %v1742_v6 = vld [vmem:[#allocation7] sm:$0xff]  }
  0x54   :  { %1483 = vmatpush3.bf16.msra.mxu0 %v1688_v22  ;;  %v1735_v63 = vld [vmem:[#allocation7 + $0x38] sm:$0xff]   ;;  %v1740_v4 = vld [vmem:[#allocation7 + $0x10] sm:$0xff]  }
  0x55   :  { %1511 = vmatpush3.bf16.msra.mxu1 %v1689_v23  ;;  %1484 = vmatprep.subr.bf16.mxu0 %v1690_v24  ;;  %v1739_v3 = vld [vmem:[#allocation7 + $0x18] sm:$0xff]  }
  0x56   :  { %1512 = vmatprep.subr.bf16.mxu1 %v1691_v25 }
  0x58   :  { %1485 = vmatpush3.bf16.msra.mxu0 %v1692_v26 }
  0x59   :  { %1513 = vmatpush3.bf16.msra.mxu1 %v1693_v27  ;;  %1486 = vmatprep.subr.bf16.mxu0 %v1694_v28 }
  0x5a   :  { %1514 = vmatprep.subr.bf16.mxu1 %v1695_v29 }
  0x5c   :  { %1487 = vmatpush3.bf16.msra.mxu0 %v1696_v30 }
  0x5d   :  { %1515 = vmatpush3.bf16.msra.mxu1 %v1697_v31  ;;  %1528 = vmatprep.subr.bf16.mxu0 %v1704_v36 }
  0x5e   :  { %1589 = vmatprep.subr.bf16.mxu1 %v1722_v50 }
  0x5f   :  { %620 = vmatmul.mubr.bf16.vlgmr.msra.gmra.mxu0 %v1698_v32 }
  0x60   :  { %669 = vmatmul.mubr.bf16.vlgmr.msra.gmra.mxu1 %v1701_v34  ;;  %1529 = vmatpush3.bf16.msra.mxu0 %v1705_v37 }
  0x61   :  { %1530 = vmatprep.subr.bf16.mxu0 %v1706_v38  ;;  %627 = vmatprep.mubr.bf16.mxu0 %v1713_v44 }
  0x62   :  { %676 = vmatprep.mubr.bf16.mxu1 %v1715_v45  ;;  %1590 = vmatpush3.bf16.msra.mxu1 %v1722_v50 }
  0x63   :  { %1595 = vmatprep.subr.bf16.mxu1 %v1735_v63 }
  0x64   :  { %1531 = vmatpush3.bf16.msra.mxu0 %v1707_v39 }
  0x65   :  { %1532 = vmatprep.subr.bf16.mxu0 %v1708_v40 }
  0x67   :  { %628 = vmatmul.mubr.bf16.gmra.mxu0 %v1718_v47 }
  0x68   :  { %1533 = vmatpush3.bf16.msra.mxu0 %v1709_v41  ;;  %677 = vmatmul.mubr.bf16.gmra.mxu1 %v1719_v48 }
  0x69   :  { %1534 = vmatprep.subr.bf16.mxu0 %v1710_v42  ;;  %717 = vmatprep.mubr.bf16.mxu0 %v1729_v54 }
  0x6a   :  { %1591 = vmatprep.mubr.msk.bf16.mxu1 %vm580_vm0, %v1730_v55 }
  0x6c   :  { %1535 = vmatpush3.bf16.msra.mxu0 %v1711_v43 }
  0x6d   :  { %1536 = vmatprep.subr.bf16.mxu0 %v1712_v46 }
  0x70   :  { %1537 = vmatpush3.bf16.msra.mxu0 %v1717_v49  ;;  %1592 = vmatmul.mubr.msk.bf16.vlgmr.msra.gmra.mxu1 %vm580_vm0, %v1731_v56 }
  0x71   :  { %1538 = vmatprep.subr.bf16.mxu0 %v1720_v51  ;;  %1596 = vmatpush3.bf16.msra.mxu1 %v1735_v63 }
  0x72   :  { %1597 = vmatprep.subr.bf16.mxu1 %v1736_v0 }
  0x74   :  { %1539 = vmatpush3.bf16.msra.mxu0 %v1721_v52 }
  0x75   :  { %1540 = vmatprep.subr.bf16.mxu0 %v1723_v53  ;;  %1598 = vmatpush3.bf16.msra.mxu1 %v1736_v0 }
  0x76   :  { %1599 = vmatprep.subr.bf16.mxu1 %v1737_v1 }
  0x78   :  { %1541 = vmatpush3.bf16.msra.mxu0 %v1724_v57 }
  0x79   :  { %1542 = vmatprep.subr.bf16.mxu0 %v1725_v58  ;;  %1600 = vmatpush3.bf16.msra.mxu1 %v1737_v1 }
  0x7a   :  { %1601 = vmatprep.subr.bf16.mxu1 %v1738_v2 }
  0x7c   :  { %1543 = vmatpush3.bf16.msra.mxu0 %v1726_v59 }
  0x7d   :  { %1602 = vmatpush3.bf16.msra.mxu1 %v1738_v2 }
  0x7e   :  { %1603 = vmatprep.subr.bf16.mxu1 %v1739_v3 }
  0x7f   :  { %718 = vmatmul.mubr.bf16.vlgmr.msra.gmra.mxu0 %v1727_v60 }
  0x80   :  { %725 = vmatprep.mubr.bf16.mxu0 %v1732_v61 }
  0x81   :  { %1604 = vmatpush3.bf16.msra.mxu1 %v1739_v3 }
  0x82   :  { %1605 = vmatprep.subr.bf16.mxu1 %v1740_v4 }
  0x85   :  { %1606 = vmatpush3.bf16.msra.mxu1 %v1740_v4 }
  0x86   :  { %1607 = vmatprep.subr.bf16.mxu1 %v1741_v5 }
  0x87   :  { %726 = vmatmul.mubr.bf16.gmra.mxu0 %v1734_v62 }
  0x89   :  { %1608 = vmatpush3.bf16.msra.mxu1 %v1741_v5 }
  0x8a   :  { %1609 = vmatprep.subr.bf16.mxu1 %v1742_v6 }
  0x8d   :  { %1610 = vmatpush3.bf16.msra.mxu1 %v1742_v6 }
 0x11f   :  { %v1488_v8 = vpop.f32.mrf.mxu0 }
 0x120   :  { %v1516_v7 = vpop.f32.mrf.mxu1 }
 0x121   :  { %v1489_v10 = vpop.f32.mrf.mxu0 }
 0x122   :  { %v1517_v9 = vpop.f32.mrf.mxu1  ;;  %v1490_v27 = vadd.f32 %v1489_v10, %v1488_v8 }
 0x123   :  { %v1491_v12 = vpop.f32.mrf.mxu0  ;;  %v1518_v28 = vadd.f32 %v1517_v9, %v1516_v7 }
 0x124   :  { %v1519_v11 = vpop.f32.mrf.mxu1 }
 0x125   :  { %v1492_v14 = vpop.f32.mrf.mxu0  ;;  %v671_v37 = vadd.f32 %v1518_v28, %v1490_v27 }
 0x126   :  { %v1520_v13 = vpop.f32.mrf.mxu1  ;;  %v1493_v29 = vadd.f32 %v1492_v14, %v1491_v12 }
 0x127   :  { %v1494_v16 = vpop.f32.mrf.mxu0  ;;  %v1521_v30 = vadd.f32 %v1520_v13, %v1519_v11 }
 0x128   :  { %v1522_v15 = vpop.f32.mrf.mxu1 }
 0x129   :  { %v1495_v18 = vpop.f32.mrf.mxu0  ;;  %v674_v38 = vadd.f32 %v1521_v30, %v1493_v29  ;;  %v814_v29 = vld [vmem:[%s2016_s5 + $0x1] sm:$0x1] }
 0x12a   :  { %v1523_v17 = vpop.f32.mrf.mxu1  ;;  %v1496_v33 = vadd.f32 %v1495_v18, %v1494_v16 }
 0x12b   :  { %v1497_v20 = vpop.f32.mrf.mxu0  ;;  %v1524_v34 = vadd.f32 %v1523_v17, %v1522_v15 }
 0x12c   :  { %v1525_v19 = vpop.f32.mrf.mxu1 }
 0x12d   :  { %v1498_v22 = vpop.f32.mrf.mxu0  ;;  %v679_v43 = vadd.f32 %v1524_v34, %v1496_v33 }
 0x12e   :  { %v1526_v21 = vpop.f32.mrf.mxu1  ;;  %v1499_v46 = vadd.f32 %v1498_v22, %v1497_v20 }
 0x12f   :  { %v1527_v47 = vadd.f32 %v1526_v21, %v1525_v19 }
 0x130   :  { %v1593_v23 = vpop.f32.mrf.mxu1 }
 0x131   :  { %v682_v54 = vadd.f32 %v1527_v47, %v1499_v46 }
 0x132   :  { %v768_v26 = vpop.f32.mrf.mxu1 }
 0x134   :  { %v1594_v36 = vpop.f32.mrf.mxu1 }
 0x136   :  { %v771_v44 = vpop.f32.mrf.mxu1 }
 0x13f   :  { %v1544_v24 = vpop.f32.mrf.mxu0 }
 0x141   :  { %v1545_v25 = vpop.f32.mrf.mxu0 }
 0x142   :  { %v1546_v32 = vadd.f32 %v1545_v25, %v1544_v24  ;;  %v810_v25 = vld [vmem:[%s2016_s5] sm:$0x1] }
 0x143   :  { %v1547_v31 = vpop.f32.mrf.mxu0 }
 0x144   :  { %v720_v41 = vadd.f32 %v1546_v32, %v671_v37 }
 0x145   :  { %v1548_v35 = vpop.f32.mrf.mxu0 }
 0x146   :  { %v1549_v39 = vadd.f32 %v1548_v35, %v1547_v31  ;;  %v769_v51 = vadd.f32 %v768_v26, %v720_v41 }
 0x147   :  { %v1550_v40 = vpop.f32.mrf.mxu0 }
 0x148   :  { %v723_v42 = vadd.f32 %v1549_v39, %v674_v38  ;;  %v793_v58 = vmul.f32 %v769_v51, %v769_v51 }
 0x149   :  { %v1551_v45 = vpop.f32.mrf.mxu0 }
 0x14a   :  { %v772_v48 = vadd.f32 %v771_v44, %v723_v42  ;;  %v1552_v49 = vadd.f32 %v1551_v45, %v1550_v40 }
 0x14b   :  { %v1553_v50 = vpop.f32.mrf.mxu0 }
 0x14c   :  { %v728_v52 = vadd.f32 %v1552_v49, %v679_v43  ;;  %v794_v55 = vmul.f32 %v772_v48, %v772_v48  ;;  %v783_v59 = vadd.f32 %v772_v48, %v769_v51 }
 0x14d   :  { %v1554_v53 = vpop.f32.mrf.mxu0 }
 0x14e   :  { %v777_v56 = vadd.f32 %v1593_v23, %v728_v52  ;;  %v1555_v57 = vadd.f32 %v1554_v53, %v1553_v50  ;;  %v797_v62 = vadd.f32 %v794_v55, %v793_v58  ;;  %v93_v23 = vlaneseq  ;;  %v1745_v52 = vld [vmem:[#allocation8 + $0x28] sm:$0xff]   ;;  %v1746_v53 = vld [vmem:[#allocation8 + $0x20] sm:$0xff]   ;;  %v1748_v55 = vld [vmem:[#allocation8 + $0x10] sm:$0xff]  }
 0x150   :  { %v795_v60 = vmul.f32 %v777_v56, %v777_v56  ;;  %v731_v61 = vadd.f32 %v1555_v57, %v682_v54  ;;  %v784_v63 = vadd.f32 %v783_v59, %v777_v56  ;;  %v94_v24 = vshrl.u32 %v93_v23, 7  ;;  %v1747_v54 = vld [vmem:[#allocation8 + $0x18] sm:$0xff]   ;;  %v1750_v57 = vld [vmem:[#allocation8] sm:$0xff]  }
 0x152   :  { %v780_v0 = vadd.f32 %v1594_v36, %v731_v61  ;;  %v798_v1 = vadd.f32 %v797_v62, %v795_v60  ;;  %v1969_v26 = vsub.s32 0, %v94_v24  ;;  %v97_v34 = vadd.s32 24, %v94_v24 }
 0x154   :  { %v785_v2 = vadd.f32 %v784_v63, %v780_v0  ;;  %v796_v3 = vmul.f32 %v780_v0, %v780_v0  ;;  %vm101_vm1 = vcmp.lt.s32.totalorder %v97_v34, 30 }
 0x155   :  { %vm1976_vm3 = vmpackc.low %vm101_vm1, %vm1902_vm2 }
 0x156   :  { %v786_v4 = vrot.slane %v785_v2, 4  ;;  %v799_v5 = vadd.f32 %v798_v1, %v796_v3 }
 0x158   :  { %v787_v6 = vadd.f32 %v786_v4, %v785_v2  ;;  %v800_v7 = vrot.slane %v799_v5, 4 }
 0x15a   :  { %v788_v8 = vrot.slane %v787_v6, 2  ;;  %v801_v9 = vadd.f32 %v800_v7, %v799_v5 }
 0x15c   :  { %v789_v10 = vadd.f32 %v788_v8, %v787_v6  ;;  %v802_v11 = vrot.slane %v801_v9, 2 }
 0x15e   :  { %v790_v12 = vrot.slane %v789_v10, 1  ;;  %v803_v13 = vadd.f32 %v802_v11, %v801_v9 }
 0x160   :  { %v791_v14 = vadd.f32 %v790_v12, %v789_v10  ;;  %v804_v15 = vrot.slane %v803_v13, 1 }
 0x162   :  { %v792_v16 = vmul.f32 0.033333335, %v791_v14  ;;  %v805_v17 = vadd.f32 %v804_v15, %v803_v13 }
 0x164   :  { %v806_v18 = vmul.f32 0.033333335, %v805_v17  ;;  %v807_v19 = vmul.f32 %v792_v16, %v792_v16 }
 0x166   :  { %v808_v20 = vsub.f32 %v806_v18, %v807_v19 }
 0x168   :  { %v809_v21 = vmax.f32 %v808_v20, 0.0 }
 0x16a   :  { %v811_v22 = vadd.f32 1e-05, %v809_v21 }
 0x16c   :  { %1759 = vrsqrt.f32 %v811_v22 }
 0x179   :  { %v1760_v27 = vpop.eup %1759 }
 0x17a   :  { %v813_v28 = vmul.f32 %v1760_v27, %v810_v25  ;;  %v991_v27 = vld [vmem:[%s2016_s5 + $0x2] sm:$0x1] }
 0x17c   :  { %v815_v30 = vmul.f32 %v813_v28, %v792_v16  ;;  %v820_v31 = vrot.slane %v813_v28, %v1969_v26 }
 0x17e   :  { %v816_v32 = vsub.f32 %v814_v29, %v815_v30  ;;  %v824_v33 = vmul.f32 %v820_v31, %v780_v0  ;;  %v821_v36 = vmul.f32 %v820_v31, %v769_v51  ;;  %v822_v37 = vmul.f32 %v820_v31, %v772_v48  ;;  %v1743_v48 = vld [vmem:[#allocation8 + $0x38] sm:$0xff]   ;;  %v1744_v51 = vld [vmem:[#allocation8 + $0x30] sm:$0xff]   ;;  %v995_v30 = vld [vmem:[%s2016_s5 + $0x3] sm:$0x1] }
 0x17f   :  { %v823_v38 = vmul.f32 %v820_v31, %v777_v56  ;;  %1615 = vmatprep.subr.bf16.mxu0 %v1743_v48  ;;  %v1749_v56 = vld [vmem:[#allocation8 + $0x8] sm:$0xff]  }
 0x180   :  { %v828_v35 = vrot.slane %v816_v32, %v1969_v26  ;;  %1616 = vmatpush3.bf16.msra.mxu0 %v1743_v48  ;;  %v1751_v48 = vld [vmem:[#allocation10 + $0x38] sm:$0xff]  }
 0x181   :  { %1617 = vmatprep.subr.bf16.mxu0 %v1744_v51  ;;  %1635 = vmatprep.subr.bf16.mxu1 %v1751_v48 }
 0x182   :  { %v832_v39 = vadd.f32 %v828_v35, %v824_v33  ;;  %v829_v40 = vadd.f32 %v828_v35, %v821_v36  ;;  %v830_v41 = vadd.f32 %v828_v35, %v822_v37  ;;  %v831_v42 = vadd.f32 %v828_v35, %v823_v38 }
 0x184   :  { %v836_v43 = vmax.f32 %v832_v39, 0.0  ;;  %v833_v44 = vmax.f32 %v829_v40, 0.0  ;;  %v834_v45 = vmax.f32 %v830_v41, 0.0  ;;  %v835_v46 = vmax.f32 %v831_v42, 0.0  ;;  %1618 = vmatpush3.bf16.msra.mxu0 %v1744_v51  ;;  %v1752_v51 = vld [vmem:[#allocation10 + $0x30] sm:$0xff]  }
 0x185   :  { %1619 = vmatprep.subr.bf16.mxu0 %v1745_v52 }
 0x186   :  { %v849_v47 = vpack.c.bf16 %v834_v45, %v833_v44  ;;  %v1428_v50 = vpack.c.bf16 %v836_v43, %v835_v46 }
 0x188   :  { %1611 = vmatprep.mubr.bf16.mxu1 %v849_v47  ;;  %1620 = vmatpush3.bf16.msra.mxu0 %v1745_v52  ;;  %v1753_v52 = vld [vmem:[#allocation10 + $0x28] sm:$0xff]  }
 0x189   :  { %1612 = vmatmul.mubr.msk.bf16.vlgmr.msra.gmra.mxu1 %vm1976_vm3, %v1428_v50  ;;  %1621 = vmatprep.subr.bf16.mxu0 %v1746_v53 }
 0x18a   :  { %1636 = vmatpush3.bf16.msra.mxu1 %v1751_v48 }
 0x18b   :  { %1637 = vmatprep.subr.bf16.mxu1 %v1752_v51 }
 0x18c   :  { %1622 = vmatpush3.bf16.msra.mxu0 %v1746_v53  ;;  %v1754_v53 = vld [vmem:[#allocation10 + $0x20] sm:$0xff]  }
 0x18d   :  { %1623 = vmatprep.subr.bf16.mxu0 %v1747_v54 }
 0x18e   :  { %1638 = vmatpush3.bf16.msra.mxu1 %v1752_v51 }
 0x18f   :  { %1639 = vmatprep.subr.bf16.mxu1 %v1753_v52 }
 0x190   :  { %1624 = vmatpush3.bf16.msra.mxu0 %v1747_v54  ;;  %v1755_v54 = vld [vmem:[#allocation10 + $0x18] sm:$0xff]  }
 0x191   :  { %1625 = vmatprep.subr.bf16.mxu0 %v1748_v55 }
 0x192   :  { %1640 = vmatpush3.bf16.msra.mxu1 %v1753_v52 }
 0x193   :  { %1641 = vmatprep.subr.bf16.mxu1 %v1754_v53 }
 0x194   :  { %1626 = vmatpush3.bf16.msra.mxu0 %v1748_v55  ;;  %v1756_v55 = vld [vmem:[#allocation10 + $0x10] sm:$0xff]  }
 0x195   :  { %1627 = vmatprep.subr.bf16.mxu0 %v1749_v56 }
 0x196   :  { %1642 = vmatpush3.bf16.msra.mxu1 %v1754_v53 }
 0x197   :  { %1643 = vmatprep.subr.bf16.mxu1 %v1755_v54 }
 0x198   :  { %1628 = vmatpush3.bf16.msra.mxu0 %v1749_v56  ;;  %v1757_v56 = vld [vmem:[#allocation10 + $0x8] sm:$0xff]  }
 0x199   :  { %1629 = vmatprep.subr.bf16.mxu0 %v1750_v57 }
 0x19a   :  { %1644 = vmatpush3.bf16.msra.mxu1 %v1755_v54 }
 0x19b   :  { %1645 = vmatprep.subr.bf16.mxu1 %v1756_v55 }
 0x19c   :  { %1630 = vmatpush3.bf16.msra.mxu0 %v1750_v57  ;;  %v1758_v57 = vld [vmem:[#allocation10] sm:$0xff]  }
 0x19e   :  { %1646 = vmatpush3.bf16.msra.mxu1 %v1756_v55 }
 0x19f   :  { %1647 = vmatprep.subr.bf16.mxu1 %v1757_v56 }
 0x1a2   :  { %1648 = vmatpush3.bf16.msra.mxu1 %v1757_v56 }
 0x1a3   :  { %1649 = vmatprep.subr.bf16.mxu1 %v1758_v57 }
 0x1a6   :  { %1650 = vmatpush3.bf16.msra.mxu1 %v1758_v57 }
 0x249   :  { %v1613_v58 = vpop.f32.mrf.mxu1 }
 0x24a   :  { %v976_v1 = vmul.f32 %v1613_v58, %v1613_v58 }
 0x24b   :  { %v949_v59 = vpop.f32.mrf.mxu1 }
 0x24c   :  { %v974_v62 = vmul.f32 %v949_v59, %v949_v59 }
 0x24d   :  { %v1614_v60 = vpop.f32.mrf.mxu1 }
 0x24e   :  { %v977_v4 = vmul.f32 %v1614_v60, %v1614_v60 }
 0x24f   :  { %v952_v61 = vpop.f32.mrf.mxu1 }
 0x250   :  { %v964_v63 = vadd.f32 %v952_v61, %v949_v59  ;;  %v975_v0 = vmul.f32 %v952_v61, %v952_v61 }
 0x252   :  { %v965_v2 = vadd.f32 %v1613_v58, %v964_v63  ;;  %v978_v3 = vadd.f32 %v975_v0, %v974_v62 }
 0x254   :  { %v966_v5 = vadd.f32 %v1614_v60, %v965_v2  ;;  %v979_v6 = vadd.f32 %v978_v3, %v976_v1 }
 0x256   :  { %v967_v7 = vrot.slane %v966_v5, 4  ;;  %v980_v8 = vadd.f32 %v979_v6, %v977_v4 }
 0x258   :  { %v968_v9 = vadd.f32 %v967_v7, %v966_v5  ;;  %v981_v10 = vrot.slane %v980_v8, 4 }
 0x25a   :  { %v969_v11 = vrot.slane %v968_v9, 2  ;;  %v982_v12 = vadd.f32 %v981_v10, %v980_v8 }
 0x25c   :  { %v970_v13 = vadd.f32 %v969_v11, %v968_v9  ;;  %v983_v14 = vrot.slane %v982_v12, 2 }
 0x25e   :  { %v971_v15 = vrot.slane %v970_v13, 1  ;;  %v984_v16 = vadd.f32 %v983_v14, %v982_v12 }
 0x260   :  { %v972_v17 = vadd.f32 %v971_v15, %v970_v13  ;;  %v985_v18 = vrot.slane %v984_v16, 1 }
 0x262   :  { %v973_v19 = vmul.f32 0.033333335, %v972_v17  ;;  %v986_v20 = vadd.f32 %v985_v18, %v984_v16 }
 0x264   :  { %v987_v21 = vmul.f32 0.033333335, %v986_v20  ;;  %v988_v22 = vmul.f32 %v973_v19, %v973_v19 }
 0x266   :  { %v989_v23 = vsub.f32 %v987_v21, %v988_v22 }
 0x268   :  { %v990_v24 = vmax.f32 %v989_v23, 0.0 }
 0x26a   :  { %v992_v25 = vadd.f32 1e-05, %v990_v24 }
 0x26c   :  { %1761 = vrsqrt.f32 %v992_v25 }
 0x279   :  { %v1762_v28 = vpop.eup %1761 }
 0x27a   :  { %v994_v29 = vmul.f32 %v1762_v28, %v991_v27  ;;  %v1164_v27 = vld [vmem:[%s2016_s5 + $0x4] sm:$0x1] }
 0x27c   :  { %v996_v31 = vmul.f32 %v994_v29, %v973_v19  ;;  %v1001_v32 = vrot.slane %v994_v29, %v1969_v26 }
 0x27e   :  { %v997_v33 = vsub.f32 %v995_v30, %v996_v31  ;;  %v1003_v34 = vmul.f32 %v1001_v32, %v952_v61  ;;  %v1004_v35 = vmul.f32 %v1613_v58, %v1001_v32  ;;  %v1005_v36 = vmul.f32 %v1614_v60, %v1001_v32  ;;  %v1168_v30 = vld [vmem:[%s2016_s5 + $0x5] sm:$0x1] }
 0x27f   :  { %v1002_v38 = vmul.f32 %v1001_v32, %v949_v59 }
 0x280   :  { %v1009_v37 = vrot.slane %v997_v33, %v1969_v26 }
 0x282   :  { %v1011_v39 = vadd.f32 %v1009_v37, %v1003_v34  ;;  %v1010_v40 = vadd.f32 %v1009_v37, %v1002_v38  ;;  %v1012_v41 = vadd.f32 %v1009_v37, %v1004_v35  ;;  %v1013_v42 = vadd.f32 %v1009_v37, %v1005_v36 }
 0x284   :  { %v1014_v43 = vmax.f32 %v1010_v40, 0.0  ;;  %v1015_v44 = vmax.f32 %v1011_v39, 0.0  ;;  %v1016_v45 = vmax.f32 %v1012_v41, 0.0  ;;  %v1017_v46 = vmax.f32 %v1013_v42, 0.0 }
 0x286   :  { %v1022_v47 = vpack.c.bf16 %v1015_v44, %v1014_v43  ;;  %v1439_v50 = vpack.c.bf16 %v1017_v46, %v1016_v45 }
 0x288   :  { %1631 = vmatprep.mubr.bf16.mxu0 %v1022_v47 }
 0x289   :  { %1632 = vmatmul.mubr.msk.bf16.vlgmr.msra.gmra.mxu0 %vm1976_vm3, %v1439_v50 }
 0x349   :  { %v1633_v58 = vpop.f32.mrf.mxu0 }
 0x34a   :  { %v1149_v1 = vmul.f32 %v1633_v58, %v1633_v58 }
 0x34b   :  { %v1122_v59 = vpop.f32.mrf.mxu0 }
 0x34c   :  { %v1147_v62 = vmul.f32 %v1122_v59, %v1122_v59 }
 0x34d   :  { %v1634_v60 = vpop.f32.mrf.mxu0 }
 0x34e   :  { %v1150_v4 = vmul.f32 %v1634_v60, %v1634_v60 }
 0x34f   :  { %v1125_v61 = vpop.f32.mrf.mxu0 }
 0x350   :  { %v1137_v63 = vadd.f32 %v1125_v61, %v1122_v59  ;;  %v1148_v0 = vmul.f32 %v1125_v61, %v1125_v61 }
 0x352   :  { %v1138_v2 = vadd.f32 %v1633_v58, %v1137_v63  ;;  %v1151_v3 = vadd.f32 %v1148_v0, %v1147_v62 }
 0x354   :  { %v1139_v5 = vadd.f32 %v1634_v60, %v1138_v2  ;;  %v1152_v6 = vadd.f32 %v1151_v3, %v1149_v1 }
 0x356   :  { %v1140_v7 = vrot.slane %v1139_v5, 4  ;;  %v1153_v8 = vadd.f32 %v1152_v6, %v1150_v4 }
 0x358   :  { %v1141_v9 = vadd.f32 %v1140_v7, %v1139_v5  ;;  %v1154_v10 = vrot.slane %v1153_v8, 4 }
 0x35a   :  { %v1142_v11 = vrot.slane %v1141_v9, 2  ;;  %v1155_v12 = vadd.f32 %v1154_v10, %v1153_v8 }
 0x35c   :  { %v1143_v13 = vadd.f32 %v1142_v11, %v1141_v9  ;;  %v1156_v14 = vrot.slane %v1155_v12, 2 }
 0x35e   :  { %v1144_v15 = vrot.slane %v1143_v13, 1  ;;  %v1157_v16 = vadd.f32 %v1156_v14, %v1155_v12 }
 0x360   :  { %v1145_v17 = vadd.f32 %v1144_v15, %v1143_v13  ;;  %v1158_v18 = vrot.slane %v1157_v16, 1 }
 0x362   :  { %v1146_v19 = vmul.f32 0.033333335, %v1145_v17  ;;  %v1159_v20 = vadd.f32 %v1158_v18, %v1157_v16 }
 0x364   :  { %v1160_v21 = vmul.f32 0.033333335, %v1159_v20  ;;  %v1161_v22 = vmul.f32 %v1146_v19, %v1146_v19 }
 0x366   :  { %v1162_v23 = vsub.f32 %v1160_v21, %v1161_v22 }
 0x368   :  { %v1163_v24 = vmax.f32 %v1162_v23, 0.0 }
 0x36a   :  { %v1165_v25 = vadd.f32 1e-05, %v1163_v24 }
 0x36c   :  { %1763 = vrsqrt.f32 %v1165_v25 }
 0x379   :  { %v1764_v28 = vpop.eup %1763 }
 0x37a   :  { %v1167_v29 = vmul.f32 %v1764_v28, %v1164_v27 }
 0x37c   :  { %v1169_v31 = vmul.f32 %v1167_v29, %v1146_v19  ;;  %v1174_v32 = vrot.slane %v1167_v29, %v1969_v26 }
 0x37e   :  { %v1170_v33 = vsub.f32 %v1168_v30, %v1169_v31  ;;  %v1176_v34 = vmul.f32 %v1174_v32, %v1125_v61  ;;  %v1175_v36 = vmul.f32 %v1174_v32, %v1122_v59  ;;  %v1177_v37 = vmul.f32 %v1633_v58, %v1174_v32 }
 0x37f   :  { %v1178_v38 = vmul.f32 %v1634_v60, %v1174_v32 }
 0x380   :  { %v1182_v35 = vrot.slane %v1170_v33, %v1969_v26  ;;  %v1441_v26 = vld [vmem:[%s2016_s5 + $0x6] ss:$0 sm:$0xff] }
 0x382   :  { %v1184_v39 = vadd.f32 %v1182_v35, %v1176_v34  ;;  %v1183_v40 = vadd.f32 %v1182_v35, %v1175_v36  ;;  %v1185_v41 = vadd.f32 %v1182_v35, %v1177_v37  ;;  %v1186_v42 = vadd.f32 %v1182_v35, %v1178_v38 }
 0x384   :  { %v1188_v43 = vmax.f32 %v1184_v39, 0.0  ;;  %v1187_v44 = vmax.f32 %v1183_v40, 0.0  ;;  %v1189_v45 = vmax.f32 %v1185_v41, 0.0  ;;  %v1190_v46 = vmax.f32 %v1186_v42, 0.0 }
 0x386   :  { %v1195_v47 = vpack.c.bf16 %v1188_v43, %v1187_v44  ;;  %v1451_v50 = vpack.c.bf16 %v1190_v46, %v1189_v45 }
 0x388   :  { %1651 = vmatprep.mubr.bf16.mxu1 %v1195_v47 }
 0x389   :  { %1652 = vmatmul.mubr.msk.bf16.vlgmr.msra.gmra.mxu1 %vm1976_vm3, %v1451_v50 }
 0x449   :  { %v1653_v48 = vpop.f32.mrf.mxu1 }
 0x44a   :  { %v1309_v53 = vadd.f32 %v1653_v48, %v1441_v26 }
 0x44b   :  { %v1300_v51 = vpop.f32.mrf.mxu1 }
 0x44c   :  { %v1301_v56 = vadd.f32 %v1441_v26, %v1300_v51 }
 0x44d   :  { %v1654_v52 = vpop.f32.mrf.mxu1 }
 0x44e   :  { %v1312_v54 = vadd.f32 %v1654_v52, %v1441_v26 }
 0x44f   :  { %v1303_v55 = vpop.f32.mrf.mxu1 }
 0x450   :  { %v1469_v57 = vpack.c.bf16 %v1312_v54, %v1309_v53  ;;  %v1304_v58 = vadd.f32 %v1441_v26, %v1303_v55 }
 0x452   :  { %1471 = vst [vmem:[#allocation11 + $0x8] sm:$0xff] %v1469_v57   ;;  %v1464_v59 = vpack.c.bf16 %v1304_v58, %v1301_v56 }
 0x454   :  { %1465 = vst [vmem:[#allocation11] sm:$0xff] %v1464_v59  }
 0x455   :  { %1876 = shalt.err (!%p1873_p1)
}
 0x456   :  { %1346 = dma.vmem_to_hbm [thread:$0]  %s1341_s13, 256, %s2017_s6, [#allocation4], %s1894_s24, %s1894_s24, %s1895_s25  }
 0x457   :  { %1891 = dma.done.wait [#allocation4], 256  }
 0x458   :  { %1892 = vsyncadd [#allocation4], 4294967040 }
 0x459   :  { %1350 = vsyncpa [#allocation3], 1 }
 0x45a   :  { %1351 = vsyncpa [#allocation6], 1 }
 0x45b   :  { %1352 = vsyncpa [#allocation9], 1 }
 0x45c   :  { %1353 = vsyncpa [#allocation4], 1 }

</bundles_post_ra>
